<compile_context>
chip_gen: v5e
topology: v5e:2x2
jax: 0.10.0
libtpu: 0.0.40
codegen_flags: <defaults>
</compile_context>

<pallas_src>
import math

import jax
import jax.numpy as jnp
from jax.experimental import pallas as pl
from jax.experimental.pallas import tpu as pltpu


def _round_up(a, m):
    return pl.cdiv(a, m) * m


def _dirsage_kernel(x_i_ref, x_k_ref, a_in_ref, a_out_ref,
                    inv_in_ref, inv_out_ref, w_ref, b_ref,
                    o_ref, agg_in_acc, agg_out_acc):
    k = pl.program_id(1)

    @pl.when(k == 0)
    def _():
        agg_in_acc[...] = jnp.zeros_like(agg_in_acc)
        agg_out_acc[...] = jnp.zeros_like(agg_out_acc)

    # int8 edge-count tile -> compute dtype on the VPU (kernel is mem-bound,
    # the cast is free filler), then accumulate the count-weighted sums in f32.
    a_in = a_in_ref[...].astype(x_k_ref.dtype)
    a_out = a_out_ref[...].astype(x_k_ref.dtype)
    xk = x_k_ref[...]
    agg_in_acc[...] += jnp.dot(a_in, xk, preferred_element_type=jnp.float32)
    agg_out_acc[...] += jnp.dot(a_out, xk, preferred_element_type=jnp.float32)

    @pl.when(k == pl.num_programs(1) - 1)
    def _():
        f_pad = x_i_ref.shape[1]
        wd = w_ref.dtype
        # Exact mean aggregation: scale the f32 accumulated sums by 1/deg once.
        agg_in = (agg_in_acc[...] * inv_in_ref[...]).astype(wd)
        agg_out = (agg_out_acc[...] * inv_out_ref[...]).astype(wd)
        # Three dots against static slices of the fused weight
        #   [W_self ; (1-a)*W1 ; a*W2]  (+ fused bias)
        h = jnp.dot(x_i_ref[...], w_ref[:f_pad, :],
                    preferred_element_type=jnp.float32)
        h = h + jnp.dot(agg_in, w_ref[f_pad:2 * f_pad, :],
                        preferred_element_type=jnp.float32)
        h = h + jnp.dot(agg_out, w_ref[2 * f_pad:, :],
                        preferred_element_type=jnp.float32)
        o_ref[...] = (h + b_ref[...]).astype(o_ref.dtype)


def dirsage_conv(x, edge_index, params, alpha, *, tn=256, tk=512,
                 compute_dtype=jnp.bfloat16):
    """DirSageConv forward.  x: [N, F] float32, edge_index: [2, E] int32."""
    N, F = x.shape
    O = params["w_self"].shape[1]
    alpha = float(alpha)

    # --- TPU-friendly padded sizes / tile selection --------------------------
    assert tn % 128 == 0 and tk % 128 == 0, "tiles must be multiples of 128"
    f_pad = _round_up(F, 128)           # feature dim (lane-dense operands)
    o_pad = _round_up(O, 128)           # output dim  (lane-dense, unmasked vst)

    n_pad128 = _round_up(N, 128)
    tn = min(tn, n_pad128)              # clamp for small graphs
    tk = min(tk, n_pad128)
    if tk >= tn:                        # keep max a multiple of min
        tk = (tk // tn) * tn
    else:
        tn = (tn // tk) * tk
    n_pad = _round_up(N, max(tn, tk))
    # v7x: two TensorCores shard the "parallel" axis -> keep >= 2 row tiles
    # when the graph is big enough (prefer shrinking tn over tk).
    while n_pad // tn < 2 and tn >= 256 and tn % 256 == 0:
        tn //= 2
    grid = (n_pad // tn, n_pad // tk)

    # --- adjacency as int8 edge counts + f32 inverse degrees -----------------
    src = edge_index[0].astype(jnp.int32)
    dst = edge_index[1].astype(jnp.int32)
    E = edge_index.shape[1]

    one_i8 = jnp.ones((E,), jnp.int8)
    # A_in[i, j]  = #edges j->i ; A_out[i, j] = #edges i->j  (built padded).
    cnt_in = jnp.zeros((n_pad, n_pad), jnp.int8).at[dst, src].add(one_i8)
    cnt_out = jnp.zeros((n_pad, n_pad), jnp.int8).at[src, dst].add(one_i8)

    one_f = jnp.ones((E,), jnp.float32)
    deg_in = jnp.zeros((N,), jnp.float32).at[dst].add(one_f)
    deg_out = jnp.zeros((N,), jnp.float32).at[src].add(one_f)
    inv_in = jnp.zeros((n_pad, 1), jnp.float32).at[:N, 0].set(
        1.0 / jnp.maximum(deg_in, 1.0))
    inv_out = jnp.zeros((n_pad, 1), jnp.float32).at[:N, 0].set(
        1.0 / jnp.maximum(deg_out, 1.0))

    x_p = jnp.zeros((n_pad, f_pad), compute_dtype).at[:N, :F].set(
        x.astype(compute_dtype))

    # --- fold alpha + biases into one fused weight / bias --------------------
    w_cat = jnp.zeros((3 * f_pad, o_pad), jnp.float32)
    w_cat = w_cat.at[:F, :O].set(params["w_self"])
    w_cat = w_cat.at[f_pad:f_pad + F, :O].set((1.0 - alpha) * params["w1"])
    w_cat = w_cat.at[2 * f_pad:2 * f_pad + F, :O].set(alpha * params["w2"])
    w_cat = w_cat.astype(compute_dtype)

    b_comb = jnp.zeros((1, o_pad), jnp.float32).at[0, :O].set(
        params["b_self"] + (1.0 - alpha) * params["b1"] + alpha * params["b2"])

    # --- VMEM budget (raise v5e's 16 MiB default, stay under v7x's 64 MiB) ---
    cbytes = jnp.dtype(compute_dtype).itemsize
    vmem_est = (
        2 * 2 * tn * tk * 1                 # A_in / A_out int8 tiles, 2 buffers
        + 2 * tk * f_pad * cbytes           # x k-tile
        + 2 * tn * f_pad * cbytes           # x row tile
        + 2 * 2 * tn * 128 * 4              # inv-degree vectors (lane-padded)
        + 2 * 3 * f_pad * o_pad * cbytes    # fused weights
        + 2 * 8 * o_pad * 4                 # fused bias (sublane-padded)
        + 2 * tn * o_pad * 4                # output tile (f32)
        + 2 * tn * f_pad * 4                # f32 accumulators
    )
    vmem_limit = int(min(max(vmem_est * 3 // 2 + (4 << 20), 32 << 20), 64 << 20))

    out = pl.pallas_call(
        _dirsage_kernel,
        out_shape=jax.ShapeDtypeStruct((n_pad, o_pad), jnp.float32),
        grid_spec=pltpu.PrefetchScalarGridSpec(
            num_scalar_prefetch=0,
            grid=grid,
            in_specs=[
                pl.BlockSpec((tn, f_pad), lambda i, k: (i, 0)),          # x row tile (self path)
                pl.BlockSpec((tk, f_pad), lambda i, k: (k, 0)),          # x k-tile (aggregation)
                pl.BlockSpec((tn, tk), lambda i, k: (i, k)),             # A_in counts (int8)
                pl.BlockSpec((tn, tk), lambda i, k: (i, k)),             # A_out counts (int8)
                pl.BlockSpec((tn, 1), lambda i, k: (i, 0)),              # 1/in_deg
                pl.BlockSpec((tn, 1), lambda i, k: (i, 0)),              # 1/out_deg
                pl.BlockSpec((3 * f_pad, o_pad), lambda i, k: (0, 0)),   # fused weights
                pl.BlockSpec((1, o_pad), lambda i, k: (0, 0)),           # fused bias
            ],
            out_specs=pl.BlockSpec((tn, o_pad), lambda i, k: (i, 0)),
            scratch_shapes=[
                pltpu.VMEM((tn, f_pad), jnp.float32),   # agg_in accumulator
                pltpu.VMEM((tn, f_pad), jnp.float32),   # agg_out accumulator
            ],
        ),
        compiler_params=pltpu.CompilerParams(
            dimension_semantics=("parallel", "arbitrary"),
            vmem_limit_bytes=vmem_limit),
    )(x_p, x_p, cnt_in, cnt_out, inv_in, inv_out, w_cat, b_comb)

    return out[:N, :O]


def _reference(x, edge_index, params, alpha):
    N = x.shape[0]
    src, dst = edge_index[0], edge_index[1]
    ones = jnp.ones((edge_index.shape[1],), jnp.float32)
    cnt_in = jnp.zeros((N, N), jnp.float32).at[dst, src].add(ones)
    cnt_out = jnp.zeros((N, N), jnp.float32).at[src, dst].add(ones)
    agg_in = (cnt_in / jnp.maximum(cnt_in.sum(1, keepdims=True), 1.0)) @ x
    agg_out = (cnt_out / jnp.maximum(cnt_out.sum(1, keepdims=True), 1.0)) @ x
    return (x @ params["w_self"] + params["b_self"]
            + (1.0 - alpha) * (agg_in @ params["w1"] + params["b1"])
            + alpha * (agg_out @ params["w2"] + params["b2"]))


def _make_problem(key, N, F, O, E):
    kx, ke1, ke2, kw0, kw1, kw2, kb0, kb1, kb2 = jax.random.split(key, 9)
    x = jax.random.normal(kx, (N, F), jnp.float32)
    edge_index = jnp.stack([
        jax.random.randint(ke1, (E,), 0, N, dtype=jnp.int32),
        jax.random.randint(ke2, (E,), 0, N, dtype=jnp.int32),
    ])
    scale = 1.0 / jnp.sqrt(jnp.float32(F))
    params = {
        "w_self": jax.random.normal(kw0, (F, O), jnp.float32) * scale,
        "w1":     jax.random.normal(kw1, (F, O), jnp.float32) * scale,
        "w2":     jax.random.normal(kw2, (F, O), jnp.float32) * scale,
        "b_self": jax.random.normal(kb0, (O,), jnp.float32) * 0.1,
        "b1":     jax.random.normal(kb1, (O,), jnp.float32) * 0.1,
        "b2":     jax.random.normal(kb2, (O,), jnp.float32) * 0.1,
    }
    return x, edge_index, params


if __name__ == "__main__":
    alpha = 0.3
    key = jax.random.PRNGKey(0)
    k_small, k_big = jax.random.split(key, 2)

    # --- small problem: default bf16-streamed path + f32 verification path ---
    x, edge_index, params = _make_problem(k_small, N=16, F=32, O=32, E=48)
    ref = _reference(x, edge_index, params, alpha)

    out_bf16 = jax.block_until_ready(dirsage_conv(x, edge_index, params, alpha))
    assert out_bf16.shape == (16, 32)
    err_bf16 = float(jnp.max(jnp.abs(out_bf16 - ref)))
    assert jnp.allclose(out_bf16, ref, atol=6e-2, rtol=6e-2), f"bf16 err={err_bf16}"

    out_f32 = jax.block_until_ready(
        dirsage_conv(x, edge_index, params, alpha, compute_dtype=jnp.float32))
    err_f32 = float(jnp.max(jnp.abs(out_f32 - ref)))
    assert jnp.allclose(out_f32, ref, atol=2e-3, rtol=2e-3), f"f32 err={err_f32}"

    # --- multi-tile problem (grid (2, 2)): exercises K-accumulation & row tiles
    xb, eb, pb = _make_problem(k_big, N=300, F=64, O=48, E=900)
    refb = _reference(xb, eb, pb, alpha)
    outb = jax.block_until_ready(
        dirsage_conv(xb, eb, pb, alpha, compute_dtype=jnp.float32))
    assert outb.shape == (300, 48)
    errb = float(jnp.max(jnp.abs(outb - refb)))
    assert jnp.allclose(outb, refb, atol=2e-3, rtol=2e-3), f"multi-tile err={errb}"

    print("KERNEL_OK")
</pallas_src>

<mosaic_0001>
module attributes {stable_mosaic.version = 11 : i64} {
  func.func @_dirsage_kernel(%arg0: i32, %arg1: i32, %arg2: memref<128x128xbf16, #tpu.memory_space<vmem>>, %arg3: memref<128x128xbf16, #tpu.memory_space<vmem>>, %arg4: memref<128x128xi8, #tpu.memory_space<vmem>>, %arg5: memref<128x128xi8, #tpu.memory_space<vmem>>, %arg6: memref<128x1xf32, #tpu.memory_space<vmem>>, %arg7: memref<128x1xf32, #tpu.memory_space<vmem>>, %arg8: memref<384x128xbf16, #tpu.memory_space<vmem>>, %arg9: memref<1x128xf32, #tpu.memory_space<vmem>>, %arg10: memref<128x128xf32, #tpu.memory_space<vmem>>, %arg11: memref<128x128xf32, #tpu.memory_space<vmem>>, %arg12: memref<128x128xf32, #tpu.memory_space<vmem>>) attributes {dimension_semantics = [#tpu.dimension_semantics<parallel>, #tpu.dimension_semantics<arbitrary>], iteration_bounds = array<i64: 1, 1>, scalar_prefetch = 0 : i64, scratch_operands = 2 : i64, tpu.core_type = #tpu.core_type<tc>, window_params = [{transform_indices = @transform_0, window_bounds = array<i64: 128, 128>}, {transform_indices = @transform_1, window_bounds = array<i64: 128, 128>}, {transform_indices = @transform_2, window_bounds = array<i64: 128, 128>}, {transform_indices = @transform_3, window_bounds = array<i64: 128, 128>}, {transform_indices = @transform_4, window_bounds = array<i64: 128, 1>}, {transform_indices = @transform_5, window_bounds = array<i64: 128, 1>}, {pipeline_mode = #tpu.pipeline_mode<synchronous>, transform_indices = @transform_6, window_bounds = array<i64: 384, 128>}, {pipeline_mode = #tpu.pipeline_mode<synchronous>, transform_indices = @transform_7, window_bounds = array<i64: 1, 128>}, {transform_indices = @transform_8, window_bounds = array<i64: 128, 128>}]} {
    %c0_i32 = arith.constant 0 : i32
    %0 = arith.cmpi eq, %arg1, %c0_i32 : i32
    %1 = arith.extui %0 : i1 to i32
    %c0_i32_0 = arith.constant 0 : i32
    %2 = arith.cmpi ne, %1, %c0_i32_0 : i32
    scf.if %2 {
      %cst_17 = arith.constant 0.000000e+00 : f32
      %19 = vector.broadcast %cst_17 : f32 to vector<128x128xf32>
      %c0_18 = arith.constant 0 : index
      %c0_19 = arith.constant 0 : index
      %20 = vector.load %arg11[%c0_18, %c0_19] : memref<128x128xf32, #tpu.memory_space<vmem>>, vector<128x128xf32>
      tpu.vector_store %arg11[%c0_18, %c0_19], %19 {strides = array<i32>} : memref<128x128xf32, #tpu.memory_space<vmem>>, vector<128x128xf32>,
      %cst_20 = arith.constant 0.000000e+00 : f32
      %21 = vector.broadcast %cst_20 : f32 to vector<128x128xf32>
      %c0_21 = arith.constant 0 : index
      %c0_22 = arith.constant 0 : index
      %22 = vector.load %arg12[%c0_21, %c0_22] : memref<128x128xf32, #tpu.memory_space<vmem>>, vector<128x128xf32>
      tpu.vector_store %arg12[%c0_21, %c0_22], %21 {strides = array<i32>} : memref<128x128xf32, #tpu.memory_space<vmem>>, vector<128x128xf32>,
    } else {
    }
    %c0 = arith.constant 0 : index
    %c0_1 = arith.constant 0 : index
    %3 = vector.load %arg4[%c0, %c0_1] : memref<128x128xi8, #tpu.memory_space<vmem>>, vector<128x128xi8>
    %4 = arith.sitofp %3 : vector<128x128xi8> to vector<128x128xbf16>
    %c0_2 = arith.constant 0 : index
    %c0_3 = arith.constant 0 : index
    %5 = vector.load %arg5[%c0_2, %c0_3] : memref<128x128xi8, #tpu.memory_space<vmem>>, vector<128x128xi8>
    %6 = arith.sitofp %5 : vector<128x128xi8> to vector<128x128xbf16>
    %c0_4 = arith.constant 0 : index
    %c0_5 = arith.constant 0 : index
    %7 = vector.load %arg3[%c0_4, %c0_5] : memref<128x128xbf16, #tpu.memory_space<vmem>>, vector<128x128xbf16>
    %c0_6 = arith.constant 0 : index
    %c0_7 = arith.constant 0 : index
    %8 = vector.load %arg11[%c0_6, %c0_7] : memref<128x128xf32, #tpu.memory_space<vmem>>, vector<128x128xf32>
    %cst = arith.constant dense<0.000000e+00> : vector<128x128xf32>
    %9 = tpu.matmul %4, %7, %cst {dimension_numbers = #tpu.dot_dimension_numbers<[1], [0], [0], [1], [0, 0, 1, 1], [], []>} : vector<128x128xbf16>, vector<128x128xbf16>, vector<128x128xf32> -> vector<128x128xf32>
    %10 = arith.addf %8, %9 : vector<128x128xf32>
    %c0_8 = arith.constant 0 : index
    %c0_9 = arith.constant 0 : index
    %11 = vector.load %arg11[%c0_8, %c0_9] : memref<128x128xf32, #tpu.memory_space<vmem>>, vector<128x128xf32>
    tpu.vector_store %arg11[%c0_8, %c0_9], %10 {strides = array<i32>} : memref<128x128xf32, #tpu.memory_space<vmem>>, vector<128x128xf32>,
    %c0_10 = arith.constant 0 : index
    %c0_11 = arith.constant 0 : index
    %12 = vector.load %arg12[%c0_10, %c0_11] : memref<128x128xf32, #tpu.memory_space<vmem>>, vector<128x128xf32>
    %cst_12 = arith.constant dense<0.000000e+00> : vector<128x128xf32>
    %13 = tpu.matmul %6, %7, %cst_12 {dimension_numbers = #tpu.dot_dimension_numbers<[1], [0], [0], [1], [0, 0, 1, 1], [], []>} : vector<128x128xbf16>, vector<128x128xbf16>, vector<128x128xf32> -> vector<128x128xf32>
    %14 = arith.addf %12, %13 : vector<128x128xf32>
    %c0_13 = arith.constant 0 : index
    %c0_14 = arith.constant 0 : index
    %15 = vector.load %arg12[%c0_13, %c0_14] : memref<128x128xf32, #tpu.memory_space<vmem>>, vector<128x128xf32>
    tpu.vector_store %arg12[%c0_13, %c0_14], %14 {strides = array<i32>} : memref<128x128xf32, #tpu.memory_space<vmem>>, vector<128x128xf32>,
    %c0_i32_15 = arith.constant 0 : i32
    %16 = arith.cmpi eq, %arg1, %c0_i32_15 : i32
    %17 = arith.extui %16 : i1 to i32
    %c0_i32_16 = arith.constant 0 : i32
    %18 = arith.cmpi ne, %17, %c0_i32_16 : i32
    scf.if %18 {
      %c0_17 = arith.constant 0 : index
      %c0_18 = arith.constant 0 : index
      %19 = vector.load %arg11[%c0_17, %c0_18] : memref<128x128xf32, #tpu.memory_space<vmem>>, vector<128x128xf32>
      %c0_19 = arith.constant 0 : index
      %c0_20 = arith.constant 0 : index
      %20 = vector.load %arg6[%c0_19, %c0_20] : memref<128x1xf32, #tpu.memory_space<vmem>>, vector<128x1xf32>
      %21 = vector.broadcast %20 : vector<128x1xf32> to vector<128x128xf32>
      %22 = arith.mulf %19, %21 : vector<128x128xf32>
      %23 = arith.truncf %22 : vector<128x128xf32> to vector<128x128xbf16>
      %c0_21 = arith.constant 0 : index
      %c0_22 = arith.constant 0 : index
      %24 = vector.load %arg12[%c0_21, %c0_22] : memref<128x128xf32, #tpu.memory_space<vmem>>, vector<128x128xf32>
      %c0_23 = arith.constant 0 : index
      %c0_24 = arith.constant 0 : index
      %25 = vector.load %arg7[%c0_23, %c0_24] : memref<128x1xf32, #tpu.memory_space<vmem>>, vector<128x1xf32>
      %26 = vector.broadcast %25 : vector<128x1xf32> to vector<128x128xf32>
      %27 = arith.mulf %24, %26 : vector<128x128xf32>
      %28 = arith.truncf %27 : vector<128x128xf32> to vector<128x128xbf16>
      %c0_25 = arith.constant 0 : index
      %c0_26 = arith.constant 0 : index
      %29 = vector.load %arg2[%c0_25, %c0_26] : memref<128x128xbf16, #tpu.memory_space<vmem>>, vector<128x128xbf16>
      %c0_27 = arith.constant 0 : index
      %c0_28 = arith.constant 0 : index
      %30 = vector.load %arg8[%c0_27, %c0_28] : memref<384x128xbf16, #tpu.memory_space<vmem>>, vector<128x128xbf16>
      %cst_29 = arith.constant dense<0.000000e+00> : vector<128x128xf32>
      %31 = tpu.matmul %29, %30, %cst_29 {dimension_numbers = #tpu.dot_dimension_numbers<[1], [0], [0], [1], [0, 0, 1, 1], [], []>} : vector<128x128xbf16>, vector<128x128xbf16>, vector<128x128xf32> -> vector<128x128xf32>
      %c128 = arith.constant 128 : index
      %c0_30 = arith.constant 0 : index
      %32 = vector.load %arg8[%c128, %c0_30] : memref<384x128xbf16, #tpu.memory_space<vmem>>, vector<128x128xbf16>
      %cst_31 = arith.constant dense<0.000000e+00> : vector<128x128xf32>
      %33 = tpu.matmul %23, %32, %cst_31 {dimension_numbers = #tpu.dot_dimension_numbers<[1], [0], [0], [1], [0, 0, 1, 1], [], []>} : vector<128x128xbf16>, vector<128x128xbf16>, vector<128x128xf32> -> vector<128x128xf32>
      %34 = arith.addf %31, %33 : vector<128x128xf32>
      %c256 = arith.constant 256 : index
      %c0_32 = arith.constant 0 : index
      %35 = vector.load %arg8[%c256, %c0_32] : memref<384x128xbf16, #tpu.memory_space<vmem>>, vector<128x128xbf16>
      %cst_33 = arith.constant dense<0.000000e+00> : vector<128x128xf32>
      %36 = tpu.matmul %28, %35, %cst_33 {dimension_numbers = #tpu.dot_dimension_numbers<[1], [0], [0], [1], [0, 0, 1, 1], [], []>} : vector<128x128xbf16>, vector<128x128xbf16>, vector<128x128xf32> -> vector<128x128xf32>
      %37 = arith.addf %34, %36 : vector<128x128xf32>
      %c0_34 = arith.constant 0 : index
      %c0_35 = arith.constant 0 : index
      %38 = vector.load %arg9[%c0_34, %c0_35] : memref<1x128xf32, #tpu.memory_space<vmem>>, vector<1x128xf32>
      %39 = vector.broadcast %38 : vector<1x128xf32> to vector<128x128xf32>
      %40 = arith.addf %37, %39 : vector<128x128xf32>
      %c0_36 = arith.constant 0 : index
      %c0_37 = arith.constant 0 : index
      %41 = vector.load %arg10[%c0_36, %c0_37] : memref<128x128xf32, #tpu.memory_space<vmem>>, vector<128x128xf32>
      tpu.vector_store %arg10[%c0_36, %c0_37], %40 {strides = array<i32>} : memref<128x128xf32, #tpu.memory_space<vmem>>, vector<128x128xf32>,
    } else {
    }
    return
  }
  func.func @transform_0(%arg0: i32, %arg1: i32) -> (i32, i32) {
    %c0_i32 = arith.constant 0 : i32
    %c0_i32_0 = arith.constant 0 : i32
    return %arg0, %c0_i32 : i32, i32
  }
  func.func @transform_1(%arg0: i32, %arg1: i32) -> (i32, i32) {
    %c0_i32 = arith.constant 0 : i32
    %c0_i32_0 = arith.constant 0 : i32
    return %arg1, %c0_i32 : i32, i32
  }
  func.func @transform_2(%arg0: i32, %arg1: i32) -> (i32, i32) {
    %c0_i32 = arith.constant 0 : i32
    return %arg0, %arg1 : i32, i32
  }
  func.func @transform_3(%arg0: i32, %arg1: i32) -> (i32, i32) {
    %c0_i32 = arith.constant 0 : i32
    return %arg0, %arg1 : i32, i32
  }
  func.func @transform_4(%arg0: i32, %arg1: i32) -> (i32, i32) {
    %c0_i32 = arith.constant 0 : i32
    %c0_i32_0 = arith.constant 0 : i32
    return %arg0, %c0_i32 : i32, i32
  }
  func.func @transform_5(%arg0: i32, %arg1: i32) -> (i32, i32) {
    %c0_i32 = arith.constant 0 : i32
    %c0_i32_0 = arith.constant 0 : i32
    return %arg0, %c0_i32 : i32, i32
  }
  func.func @transform_6(%arg0: i32, %arg1: i32) -> (i32, i32) {
    %c0_i32 = arith.constant 0 : i32
    %c0_i32_0 = arith.constant 0 : i32
    %c0_i32_1 = arith.constant 0 : i32
    return %c0_i32, %c0_i32_0 : i32, i32
  }
  func.func @transform_7(%arg0: i32, %arg1: i32) -> (i32, i32) {
    %c0_i32 = arith.constant 0 : i32
    %c0_i32_0 = arith.constant 0 : i32
    %c0_i32_1 = arith.constant 0 : i32
    return %c0_i32, %c0_i32_0 : i32, i32
  }
  func.func @transform_8(%arg0: i32, %arg1: i32) -> (i32, i32) {
    %c0_i32 = arith.constant 0 : i32
    %c0_i32_0 = arith.constant 0 : i32
    return %arg0, %c0_i32 : i32, i32
  }
}

</mosaic_0001>

<bundles_post_ra>
// kernel: tpu_custom_call.1
= control target key start
LH: loop header
LB: loop body
LE: loop exit
PB: predicated region body
PF: predicated region fallthrough
CT: control target
= control target key end

     0   :  { %13 = vsyncpa [#allocation5], 0  ;;  %s1916_s0 = inlined_call_operand.vmem [shape: bf16[128,128], index: 0, kind: input, shape index: {}]   ;;  %s1917_s1 = inlined_call_operand.hbm [shape: bf16[128,128], index: 1, kind: input, shape index: {}]   ;;  %s1918_s2 = inlined_call_operand.hbm [shape: s8[128,128], index: 2, kind: input, shape index: {}]   ;;  %s1919_s3 = inlined_call_operand.hbm [shape: s8[128,128], index: 3, kind: input, shape index: {}]   ;;  %s1920_s4 = inlined_call_operand.vmem [shape: f32[128,1], index: 4, kind: input, shape index: {}]   ;;  %s1921_s5 = inlined_call_operand.vmem [shape: f32[128,1], index: 5, kind: input, shape index: {}]   ;;  %s1922_s6 = inlined_call_operand.vmem [shape: bf16[384,128], index: 6, kind: input, shape index: {}]   ;;  %s1923_s7 = inlined_call_operand.vmem [shape: f32[1,128], index: 7, kind: input, shape index: {}]   ;;  %s1924_s8 = inlined_call_operand.hbm [shape: f32[128,128], index: 8, kind: output, shape index: {}]  }
   0x1   :  { %14 = vsyncpa [#allocation8], 0  ;;  %s35_s29 = sshll.u32 %s1918_s2, 4  ;;  %s36_s29 = int_to_ptr.hbm [resolvable:$true] %s35_s29 }
   0x2   :  { %15 = vsyncpa [#allocation6], 0  ;;  %s1548_s30 = smov [#allocation7]   ;;  %s22_s12 = sshll.u32 %s1917_s1, 4  ;;  %s23_s12 = int_to_ptr.hbm [resolvable:$true] %s22_s12 }
   0x3   :  { %s37_s9 = sshll.u32 %s1548_s30, 4  ;;  %s1549_s13 = smov 128   ;;  %s38_s9 = int_to_ptr.vmem [resolvable:$true] %s37_s9 }
   0x4   :  { %s1550_s14 = smov 8   ;;  %s1551_s15 = smov [#allocation4]  }
   0x5   :  { %43 = dma.hbm_to_vmem [thread:$0]  %s36_s29, 512, %s38_s9, [#allocation8], %s1549_s13, %s1549_s13, %s1550_s14  }
   0x6   :  { %s24_s16 = sshll.u32 %s1551_s15, 4  ;;  %s1552_s2 = smov 64   ;;  %s25_s16 = int_to_ptr.vmem [resolvable:$true] %s24_s16 }
   0x7   :  { %s1553_s17 = smov 4   ;;  %s48_s20 = sshll.u32 %s1919_s3, 4  ;;  %s49_s20 = int_to_ptr.hbm [resolvable:$true] %s48_s20 }
   0x8   :  { %30 = dma.hbm_to_vmem [thread:$0]  %s23_s12, 1024, %s25_s16, [#allocation5], %s1552_s2, %s1552_s2, %s1553_s17  }
   0x9   :  { %s1554_s21 = smov [#allocation9]  }
   0xa   :  { %s50_s1 = sshll.u32 %s1554_s21, 4  ;;  %s51_s1 = int_to_ptr.vmem [resolvable:$true] %s50_s1 }
   0xb   :  { %56 = dma.hbm_to_vmem [thread:$0]  %s49_s20, 512, %s51_s1, [#allocation8], %s1549_s13, %s1549_s13, %s1550_s14  }
   0xc   :  { %1542 = dma.done.wait [#allocation5], 1024  }
   0xd   :  { %1543 = vsyncadd [#allocation5], 4294966272 }
   0xe   :  { %1544 = dma.done.wait [#allocation8], 1024  }
   0xf   :  { %1545 = vsyncadd [#allocation8], 4294966272  ;;  %v1555_v0 = vmov 0   ;;  %v614_v1 = vld [vmem:[%s1921_s5] sm:$0xff]  ;;  %v1623_v3 = vld [vmem:[#allocation4 + $0x38] sm:$0xff]  ;;  %s1195_s9 = sshll.u32 %s1924_s8, 4  ;;  %s1196_s9 = int_to_ptr.hbm [resolvable:$true] %s1195_s9 }
  0x10   :  { %1443 = vset.pattern.permute.xlu1 %v1555_v0  ;;  %1442 = vset.pattern.permute.xlu0 %v1555_v0  ;;  %v478_v2 = vld [vmem:[%s1920_s4] sm:$0xff]  ;;  %v1627_v4 = vld [vmem:[#allocation4 + $0x30] sm:$0xff]  ;;  %v615_v6 = vld [vmem:[%s1921_s5 + $0x8] sm:$0xff] }
  0x11   :  { %1444 = vset.pattern.permute.xlu2 %v1555_v0  ;;  %632 = vperm.xlu1 %1443, %v614_v1   ;;  %v480_v5 = vld [vmem:[%s1920_s4 + $0x10] sm:$0xff]  ;;  %v479_v7 = vld [vmem:[%s1920_s4 + $0x8] sm:$0xff]  ;;  %v1648_v9 = vld [vmem:[#allocation4 + $0x20] sm:$0xff] }
  0x12   :  { %496 = vperm.xlu0 %1442, %v478_v2   ;;  %281 = vmatpush.bf16.msra.mxu0 %v1623_v3  ;;  %v1642_v8 = vld [vmem:[#allocation4 + $0x28] sm:$0xff]  ;;  %v481_v10 = vld [vmem:[%s1920_s4 + $0x18] sm:$0xff]  ;;  %v616_v12 = vld [vmem:[%s1921_s5 + $0x10] sm:$0xff] }
  0x13   :  { %1409 = vmatpush.bf16.msra.mxu1 %v1623_v3  ;;  %1410 = vmatpush.bf16.msra.mxu2 %v1623_v3  ;;  %v617_v11 = vld [vmem:[%s1921_s5 + $0x18] sm:$0xff]  ;;  %v1669_v14 = vld [vmem:[#allocation4 + $0x10] sm:$0xff]  ;;  %v1673_v15 = vld [vmem:[#allocation7] sm:$0xff] }
  0x14   :  { %1411 = vmatpush.bf16.msra.mxu3 %v1623_v3  ;;  %506 = vperm.xlu2 %1444, %v480_v5   ;;  %v1663_v13 = vld [vmem:[#allocation4 + $0x18] sm:$0xff]  ;;  %v1675_v16 = vld [vmem:[#allocation7 + $0x8] sm:$0xff]  ;;  %v1677_v17 = vld [vmem:[#allocation7 + $0x10] sm:$0xff]  ;;  %v117_v23 = vunpack.c.0.s8 %v1673_v15  ;;  %v118_v24 = vunpack.c.1.s8 %v1673_v15  ;;  %v119_v50 = vunpack.c.2.s8 %v1673_v15  ;;  %v120_v51 = vunpack.c.3.s8 %v1673_v15 }
  0x15   :  { %v1679_v18 = vld [vmem:[#allocation7 + $0x18] sm:$0xff]  ;;  %v482_v19 = vld [vmem:[%s1920_s4 + $0x20] sm:$0xff]  ;;  %v483_v21 = vld [vmem:[%s1920_s4 + $0x28] sm:$0xff]  ;;  %v121_v25 = vunpack.c.0.s8 %v1675_v16  ;;  %v122_v26 = vunpack.c.1.s8 %v1675_v16  ;;  %v125_v27 = vunpack.c.0.s8 %v1677_v17  ;;  %v126_v28 = vunpack.c.1.s8 %v1677_v17 }
  0x16   :  { %282 = vmatpush.bf16.msra.mxu0 %v1627_v4  ;;  %v618_v20 = vld [vmem:[%s1921_s5 + $0x20] sm:$0xff]  ;;  %v1692_v22 = vld [vmem:[#allocation4 + $0x8] sm:$0xff]  ;;  %v129_v29 = vunpack.c.0.s8 %v1679_v18  ;;  %v130_v30 = vunpack.c.1.s8 %v1679_v18  ;;  %v133_v32 = vcvt.s32.f32 %v117_v23  ;;  %v134_v33 = vcvt.s32.f32 %v118_v24  ;;  %v485_v41 = vld [vmem:[%s1920_s4 + $0x38] sm:$0xff] }
  0x17   :  { %1412 = vmatpush.bf16.msra.mxu1 %v1627_v4  ;;  %1413 = vmatpush.bf16.msra.mxu2 %v1627_v4  ;;  %v1706_v31 = vld [vmem:[#allocation4] sm:$0xff]  ;;  %v137_v34 = vcvt.s32.f32 %v121_v25  ;;  %v138_v35 = vcvt.s32.f32 %v122_v26  ;;  %v141_v36 = vcvt.s32.f32 %v125_v27  ;;  %v142_v37 = vcvt.s32.f32 %v126_v28  ;;  %v619_v40 = vld [vmem:[%s1921_s5 + $0x28] sm:$0xff]  ;;  %v484_v42 = vld [vmem:[%s1920_s4 + $0x30] sm:$0xff] }
  0x18   :  { %1414 = vmatpush.bf16.msra.mxu3 %v1627_v4  ;;  %v145_v38 = vcvt.s32.f32 %v129_v29  ;;  %v146_v39 = vcvt.s32.f32 %v130_v30  ;;  %v149_v43 = vpack.c.bf16 %v134_v33, %v133_v32  ;;  %v620_v47 = vld [vmem:[%s1921_s5 + $0x30] sm:$0xff]  ;;  %v486_v48 = vld [vmem:[%s1920_s4 + $0x40] sm:$0xff]  ;;  %v621_v49 = vld [vmem:[%s1921_s5 + $0x38] sm:$0xff]  ;;  %v123_v52 = vunpack.c.2.s8 %v1675_v16 }
  0x19   :  { %637 = vperm.xlu1 %1443, %v615_v6   ;;  %v151_v44 = vpack.c.bf16 %v138_v35, %v137_v34  ;;  %v153_v45 = vpack.c.bf16 %v142_v37, %v141_v36  ;;  %v124_v53 = vunpack.c.3.s8 %v1675_v16  ;;  %v127_v54 = vunpack.c.2.s8 %v1677_v17  ;;  %v487_v2 = vld [vmem:[%s1920_s4 + $0x48] sm:$0xff]  ;;  %v493_v28 = vld [vmem:[%s1920_s4 + $0x78] sm:$0xff]  ;;  %v628_v30 = vld [vmem:[%s1921_s5 + $0x70] sm:$0xff] }
  0x1a   :  { %501 = vperm.xlu0 %1442, %v479_v7   ;;  %283 = vmatpush.bf16.msra.mxu0 %v1642_v8  ;;  %v155_v46 = vpack.c.bf16 %v146_v39, %v145_v38  ;;  %v128_v55 = vunpack.c.3.s8 %v1677_v17  ;;  %v131_v56 = vunpack.c.2.s8 %v1679_v18  ;;  %v132_v57 = vunpack.c.3.s8 %v1679_v18  ;;  %v625_v17 = vld [vmem:[%s1921_s5 + $0x58] sm:$0xff]  ;;  %v491_v18 = vld [vmem:[%s1920_s4 + $0x68] sm:$0xff] }
  0x1b   :  { %1415 = vmatpush.bf16.msra.mxu1 %v1642_v8  ;;  %1416 = vmatpush.bf16.msra.mxu2 %v1642_v8  ;;  %v135_v58 = vcvt.s32.f32 %v119_v50  ;;  %v136_v59 = vcvt.s32.f32 %v120_v51  ;;  %v139_v60 = vcvt.s32.f32 %v123_v52  ;;  %v140_v61 = vcvt.s32.f32 %v124_v53  ;;  %v627_v23 = vld [vmem:[%s1921_s5 + $0x68] sm:$0xff]  ;;  %v629_v29 = vld [vmem:[%s1921_s5 + $0x78] sm:$0xff]  ;;  %v1397_v50 = vld [vmem:[%s1922_s6 + $0x60] sm:$0xff] }
  0x1c   :  { %1417 = vmatpush.bf16.msra.mxu3 %v1642_v8  ;;  %511 = vperm.xlu2 %1444, %v481_v10   ;;  %v143_v62 = vcvt.s32.f32 %v127_v54  ;;  %v144_v63 = vcvt.s32.f32 %v128_v55  ;;  %v147_v0 = vcvt.s32.f32 %v131_v56  ;;  %v148_v1 = vcvt.s32.f32 %v132_v57  ;;  %v488_v10 = vld [vmem:[%s1920_s4 + $0x50] sm:$0xff]  ;;  %v158_v32 = vld [vmem:[#allocation9 + $0x8] sm:$0xff]  ;;  %v1389_v51 = vld [vmem:[%s1922_s6 + $0x20] sm:$0xff] }
  0x1d   :  { %v150_v5 = vpack.c.bf16 %v136_v59, %v135_v58  ;;  %v152_v6 = vpack.c.bf16 %v140_v61, %v139_v60  ;;  %v165_v33 = vunpack.c.0.s8 %v158_v32  ;;  %v166_v34 = vunpack.c.1.s8 %v158_v32  ;;  %v1396_v56 = vld [vmem:[%s1922_s6 + $0x58] sm:$0xff]  ;;  %v1395_v59 = vld [vmem:[%s1922_s6 + $0x50] sm:$0xff]  ;;  %v1394_v61 = vld [vmem:[%s1922_s6 + $0x48] sm:$0xff] }
  0x1e   :  { %284 = vmatpush.bf16.msra.mxu0 %v1648_v9  ;;  %v154_v7 = vpack.c.bf16 %v144_v63, %v143_v62  ;;  %v167_v38 = vunpack.c.2.s8 %v158_v32  ;;  %v168_v39 = vunpack.c.3.s8 %v158_v32  ;;  %v1388_v57 = vld [vmem:[%s1922_s6 + $0x18] sm:$0xff]  ;;  %v1387_v60 = vld [vmem:[%s1922_s6 + $0x10] sm:$0xff]  ;;  %v1386_v62 = vld [vmem:[%s1922_s6 + $0x8] sm:$0xff] }
  0x1f   :  { %1418 = vmatpush.bf16.msra.mxu1 %v1648_v9  ;;  %1419 = vmatpush.bf16.msra.mxu2 %v1648_v9  ;;  %v181_v35 = vcvt.s32.f32 %v165_v33  ;;  %v182_v36 = vcvt.s32.f32 %v166_v34 }
  0x20   :  { %1420 = vmatpush.bf16.msra.mxu3 %v1648_v9 }
  0x21   :  { %647 = vperm.xlu1 %1443, %v617_v11   ;;  %v624_v11 = vld [vmem:[%s1921_s5 + $0x50] sm:$0xff]  ;;  %v195_v37 = vpack.c.bf16 %v182_v36, %v181_v35 }
  0x22   :  { %642 = vperm.xlu0 %1442, %v616_v12   ;;  %285 = vmatpush.bf16.msra.mxu0 %v1663_v13  ;;  %v489_v12 = vld [vmem:[%s1920_s4 + $0x58] sm:$0xff]  ;;  %v1379_v35 = vld [vmem:[%s1916_s0 + $0x10] sm:$0xff] }
  0x23   :  { %1421 = vmatpush.bf16.msra.mxu1 %v1663_v13  ;;  %1422 = vmatpush.bf16.msra.mxu2 %v1663_v13 }
  0x24   :  { %1423 = vmatpush.bf16.msra.mxu3 %v1663_v13  ;;  %516 = vperm.xlu2 %1444, %v482_v19   ;;  %v490_v19 = vld [vmem:[%s1920_s4 + $0x60] sm:$0xff] }
  0x26   :  { %286 = vmatpush.bf16.msra.mxu0 %v1669_v14 }
  0x27   :  { %1424 = vmatpush.bf16.msra.mxu1 %v1669_v14  ;;  %1425 = vmatpush.bf16.msra.mxu2 %v1669_v14 }
  0x28   :  { %1426 = vmatpush.bf16.msra.mxu3 %v1669_v14 }
  0x29   :  { %652 = vperm.xlu1 %1443, %v618_v20  }
  0x2a   :  { %521 = vperm.xlu0 %1442, %v483_v21   ;;  %287 = vmatpush.bf16.msra.mxu0 %v1692_v22  ;;  %v626_v21 = vld [vmem:[%s1921_s5 + $0x60] sm:$0xff] }
  0x2b   :  { %1427 = vmatpush.bf16.msra.mxu1 %v1692_v22  ;;  %1428 = vmatpush.bf16.msra.mxu2 %v1692_v22 }
  0x2c   :  { %1429 = vmatpush.bf16.msra.mxu3 %v1692_v22  ;;  %657 = vperm.xlu2 %1444, %v619_v40   ;;  %v183_v40 = vcvt.s32.f32 %v167_v38 }
  0x2e   :  { %288 = vmatpush.bf16.msra.mxu0 %v1706_v31 }
  0x2f   :  { %1430 = vmatpush.bf16.msra.mxu1 %v1706_v31  ;;  %1431 = vmatpush.bf16.msra.mxu2 %v1706_v31 }
  0x30   :  { %1432 = vmatpush.bf16.msra.mxu3 %v1706_v31 }
  0x31   :  { %531 = vperm.xlu1 %1443, %v485_v41   ;;  %289 = vmatmul.bf16.vlgmr.msra.gmra.mxu0 %v149_v43  ;;  %v184_v41 = vcvt.s32.f32 %v168_v39  ;;  %v1392_v43 = vld [vmem:[%s1922_s6 + $0x38] sm:$0xff] }
  0x32   :  { %526 = vperm.xlu0 %1442, %v484_v42   ;;  %299 = vmatmul.bf16.vlgmr.msra.gmra.mxu1 %v151_v44  ;;  %v1400_v42 = vld [vmem:[%s1922_s6 + $0x78] sm:$0xff]  ;;  %v1399_v44 = vld [vmem:[%s1922_s6 + $0x70] sm:$0xff] }
  0x33   :  { %378 = vmatpush.bf16.msrb.mxu1 %v1623_v3  ;;  %309 = vmatmul.bf16.vlgmr.msra.gmra.mxu2 %v153_v45  ;;  %v623_v3 = vld [vmem:[%s1921_s5 + $0x48] sm:$0xff]  ;;  %v1391_v45 = vld [vmem:[%s1922_s6 + $0x30] sm:$0xff] }
  0x34   :  { %319 = vmatmul.bf16.vlgmr.msra.gmra.mxu3 %v155_v46  ;;  %662 = vperm.xlu2 %1444, %v620_v47   ;;  %v196_v46 = vpack.c.bf16 %v184_v41, %v183_v40  ;;  %v159_v47 = vld [vmem:[#allocation9 + $0x10] sm:$0xff] }
  0x35   :  { %830 = vmatpush.bf16.msrb.mxu2 %v1400_v42  ;;  %975 = vmatpush.bf16.msrb.mxu3 %v1392_v43  ;;  %v169_v52 = vunpack.c.0.s8 %v159_v47  ;;  %v170_v53 = vunpack.c.1.s8 %v159_v47  ;;  %v171_v63 = vunpack.c.2.s8 %v159_v47 }
  0x37   :  { %379 = vmatpush.bf16.msrb.mxu1 %v1627_v4  ;;  %v622_v4 = vld [vmem:[%s1921_s5 + $0x40] sm:$0xff]  ;;  %v185_v54 = vcvt.s32.f32 %v169_v52  ;;  %v186_v55 = vcvt.s32.f32 %v170_v53 }
  0x39   :  { %536 = vperm.xlu1 %1443, %v486_v48   ;;  %831 = vmatpush.bf16.msrb.mxu2 %v1399_v44  ;;  %v1398_v48 = vld [vmem:[%s1922_s6 + $0x68] sm:$0xff]  ;;  %v197_v58 = vpack.c.bf16 %v186_v55, %v185_v54 }
  0x3a   :  { %667 = vperm.xlu0 %1442, %v621_v49   ;;  %976 = vmatpush.bf16.msrb.mxu3 %v1391_v45  ;;  %v1390_v49 = vld [vmem:[%s1922_s6 + $0x28] sm:$0xff] }
  0x3b   :  { %380 = vmatpush.bf16.msrb.mxu1 %v1642_v8  ;;  %v156_v8 = vpack.c.bf16 %v148_v1, %v147_v0  ;;  %v172_v0 = vunpack.c.3.s8 %v159_v47  ;;  %v1393_v1 = vld [vmem:[%s1922_s6 + $0x40] sm:$0xff] }
  0x3c   :  { %541 = vperm.xlu2 %1444, %v487_v2   ;;  %v1385_v2 = vld [vmem:[%s1922_s6] sm:$0xff] }
  0x3d   :  { %832 = vmatpush.bf16.msrb.mxu2 %v1398_v48 }
  0x3e   :  { %977 = vmatpush.bf16.msrb.mxu3 %v1390_v49  ;;  %v1380_v49 = vld [vmem:[%s1916_s0 + $0x18] sm:$0xff] }
  0x3f   :  { %381 = vmatpush.bf16.msrb.mxu1 %v1648_v9  ;;  %v157_v9 = vld [vmem:[#allocation9] sm:$0xff] }
  0x40   :  { %v162_v15 = vunpack.c.1.s8 %v157_v9  ;;  %v163_v24 = vunpack.c.2.s8 %v157_v9  ;;  %v164_v25 = vunpack.c.3.s8 %v157_v9 }
  0x41   :  { %677 = vperm.xlu1 %1443, %v623_v3   ;;  %294 = vmatmul.bf16.gmra.mxu0 %v150_v5  ;;  %v187_v3 = vcvt.s32.f32 %v171_v63  ;;  %v1377_v5 = vld [vmem:[%s1916_s0] sm:$0xff] }
  0x42   :  { %672 = vperm.xlu0 %1442, %v622_v4   ;;  %304 = vmatmul.bf16.gmra.mxu1 %v152_v6  ;;  %v178_v16 = vcvt.s32.f32 %v162_v15  ;;  %v179_v26 = vcvt.s32.f32 %v163_v24  ;;  %v180_v27 = vcvt.s32.f32 %v164_v25  ;;  %v188_v4 = vcvt.s32.f32 %v172_v0  ;;  %v1408_v6 = vld [vmem:[%s1922_s6 + $0xb8] sm:$0xff] }
  0x43   :  { %382 = vmatpush.bf16.msrb.mxu1 %v1663_v13  ;;  %314 = vmatmul.bf16.gmra.mxu2 %v154_v7  ;;  %v161_v13 = vunpack.c.0.s8 %v157_v9  ;;  %v160_v9 = vld [vmem:[#allocation9 + $0x18] sm:$0xff] }
  0x44   :  { %324 = vmatmul.bf16.gmra.mxu3 %v156_v8  ;;  %546 = vperm.xlu2 %1444, %v488_v10   ;;  %v198_v7 = vpack.c.bf16 %v188_v4, %v187_v3  ;;  %v1407_v8 = vld [vmem:[%s1922_s6 + $0xb0] sm:$0xff]  ;;  %v1406_v10 = vld [vmem:[%s1922_s6 + $0xa8] sm:$0xff] }
  0x45   :  { %833 = vmatpush.bf16.msrb.mxu2 %v1397_v50  ;;  %978 = vmatpush.bf16.msrb.mxu3 %v1389_v51 }
  0x46   :  { %1088 = vmatpush.bf16.msrb.mxu0 %v1408_v6 }
  0x47   :  { %383 = vmatpush.bf16.msrb.mxu1 %v1669_v14  ;;  %v177_v14 = vcvt.s32.f32 %v161_v13  ;;  %v1405_v13 = vld [vmem:[%s1922_s6 + $0xa0] sm:$0xff] }
  0x49   :  { %682 = vperm.xlu1 %1443, %v624_v11   ;;  %v193_v20 = vpack.c.bf16 %v178_v16, %v177_v14  ;;  %834 = vmatpush.bf16.msrb.mxu2 %v1396_v56  ;;  %v173_v11 = vunpack.c.0.s8 %v160_v9  ;;  %v1378_v16 = vld [vmem:[%s1916_s0 + $0x8] sm:$0xff] }
  0x4a   :  { %551 = vperm.xlu0 %1442, %v489_v12   ;;  %979 = vmatpush.bf16.msrb.mxu3 %v1388_v57  ;;  %v174_v12 = vunpack.c.1.s8 %v160_v9 }
  0x4b   :  { %384 = vmatpush.bf16.msrb.mxu1 %v1692_v22  ;;  %v492_v22 = vld [vmem:[%s1920_s4 + $0x70] sm:$0xff]  ;;  %1089 = vmatpush.bf16.msrb.mxu0 %v1407_v8  ;;  %v189_v15 = vcvt.s32.f32 %v173_v11 }
  0x4c   :  { %687 = vperm.xlu2 %1444, %v625_v17   ;;  %v190_v14 = vcvt.s32.f32 %v174_v12  ;;  %v1382_v12 = vld [vmem:[%s1916_s0 + $0x28] sm:$0xff] }
  0x4d   :  { %835 = vmatpush.bf16.msrb.mxu2 %v1395_v59 }
  0x4e   :  { %980 = vmatpush.bf16.msrb.mxu3 %v1387_v60 }
  0x4f   :  { %385 = vmatpush.bf16.msrb.mxu1 %v1706_v31  ;;  %v194_v31 = vpack.c.bf16 %v180_v27, %v179_v26  ;;  %1090 = vmatpush.bf16.msrb.mxu0 %v1406_v10  ;;  %v175_v26 = vunpack.c.2.s8 %v160_v9  ;;  %v176_v27 = vunpack.c.3.s8 %v160_v9 }
  0x51   :  { %561 = vperm.xlu1 %1443, %v491_v18   ;;  %836 = vmatpush.bf16.msrb.mxu2 %v1394_v61  ;;  %v1404_v18 = vld [vmem:[%s1922_s6 + $0x98] sm:$0xff]  ;;  %v191_v33 = vcvt.s32.f32 %v175_v26  ;;  %v192_v34 = vcvt.s32.f32 %v176_v27  ;;  %v1383_v27 = vld [vmem:[%s1916_s0 + $0x30] sm:$0xff] }
  0x52   :  { %556 = vperm.xlu0 %1442, %v490_v19   ;;  %386 = vmatmul.bf16.vlgmr.msrb.gmra.mxu1 %v193_v20  ;;  %v199_v19 = vpack.c.bf16 %v190_v14, %v189_v15 }
  0x53   :  { %981 = vmatpush.bf16.msrb.mxu3 %v1386_v62  ;;  %1091 = vmatpush.bf16.msrb.mxu0 %v1405_v13  ;;  %v200_v38 = vpack.c.bf16 %v192_v34, %v191_v33  ;;  %v1381_v62 = vld [vmem:[%s1916_s0 + $0x20] sm:$0xff] }
  0x54   :  { %692 = vperm.xlu2 %1444, %v626_v21  }
  0x55   :  { %837 = vmatpush.bf16.msrb.mxu2 %v1393_v1 }
  0x57   :  { %982 = vmatpush.bf16.msrb.mxu3 %v1385_v2  ;;  %1092 = vmatpush.bf16.msrb.mxu0 %v1404_v18 }
  0x59   :  { %566 = vperm.xlu1 %1443, %v492_v22   ;;  %v1403_v22 = vld [vmem:[%s1922_s6 + $0x90] sm:$0xff] }
  0x5a   :  { %697 = vperm.xlu0 %1442, %v627_v23   ;;  %983 = vmatmul.bf16.vlgmr.msrb.gmra.mxu3 %v1377_v5  ;;  %v1402_v23 = vld [vmem:[%s1922_s6 + $0x88] sm:$0xff] }
  0x5b   :  { %1093 = vmatpush.bf16.msrb.mxu0 %v1403_v22 }
  0x5c   :  { %571 = vperm.xlu2 %1444, %v493_v28  }
  0x5f   :  { %1094 = vmatpush.bf16.msrb.mxu0 %v1402_v23 }
  0x61   :  { %707 = vperm.xlu1 %1443, %v629_v29  }
  0x62   :  { %702 = vperm.xlu0 %1442, %v628_v30   ;;  %391 = vmatmul.bf16.gmra.mxu1 %v194_v31  ;;  %v1401_v31 = vld [vmem:[%s1922_s6 + $0x80] sm:$0xff] }
  0x63   :  { %1095 = vmatpush.bf16.msrb.mxu0 %v1401_v31 }
  0x6a   :  { %988 = vmatmul.bf16.gmra.mxu3 %v1378_v16 }
  0x72   :  { %396 = vmatmul.bf16.gmra.mxu1 %v195_v37  ;;  %v507_v37 = vpop.permute.xlu2 %506 }
  0x7a   :  { %993 = vmatmul.bf16.gmra.mxu3 %v1379_v35  ;;  %v512_v42 = vpop.permute.xlu2 %511 }
  0x82   :  { %401 = vmatmul.bf16.gmra.mxu1 %v196_v46  ;;  %v517_v54 = vpop.permute.xlu2 %516 }
  0x83   :  { %v633_v36 = vpop.permute.xlu1 %632 }
  0x84   :  { %v497_v17 = vpop.permute.xlu0 %496 }
  0x8a   :  { %998 = vmatmul.bf16.gmra.mxu3 %v1380_v49  ;;  %v658_v0 = vpop.permute.xlu2 %657 }
  0x8b   :  { %v638_v41 = vpop.permute.xlu1 %637 }
  0x8c   :  { %v502_v24 = vpop.permute.xlu0 %501 }
  0x92   :  { %406 = vmatmul.bf16.gmra.mxu1 %v197_v58  ;;  %v663_v11 = vpop.permute.xlu2 %662 }
  0x93   :  { %v648_v51 = vpop.permute.xlu1 %647 }
  0x94   :  { %v643_v48 = vpop.permute.xlu0 %642 }
  0x9a   :  { %1003 = vmatmul.bf16.gmra.mxu3 %v1381_v62 }
  0x9b   :  { %v653_v61 = vpop.permute.xlu1 %652 }
  0x9c   :  { %v522_v52 = vpop.permute.xlu0 %521 }
  0xa2   :  { %411 = vmatmul.bf16.gmra.mxu1 %v198_v7 }
  0xa3   :  { %v532_v1 = vpop.permute.xlu1 %531 }
  0xa4   :  { %v527_v4 = vpop.permute.xlu0 %526 }
  0xaa   :  { %1008 = vmatmul.bf16.gmra.mxu3 %v1382_v12 }
  0xab   :  { %v537_v16 = vpop.permute.xlu1 %536 }
  0xac   :  { %v668_v14 = vpop.permute.xlu0 %667 }
  0xae   :  { %v290_v20 = vpop.f32.mrf.mxu0 }
  0xaf   :  { %v300_v21 = vpop.f32.mrf.mxu1  ;;  %v574_v25 = vmul.f32 %v497_v17, %v290_v20  ;;  %v542_v17 = vpop.permute.xlu2 %541 }
  0xb0   :  { %v578_v56 = vmul.f32 %v517_v54, %v300_v21 }
  0xb2   :  { %416 = vmatmul.bf16.gmra.mxu1 %v199_v19 }
  0xb4   :  { %v673_v26 = vpop.permute.xlu0 %672 }
  0xb6   :  { %v292_v28 = vpop.f32.mrf.mxu0  ;;  %v310_v2 = vpop.f32.mrf.mxu2 }
  0xb7   :  { %v302_v29 = vpop.f32.mrf.mxu1  ;;  %v575_v30 = vmul.f32 %v502_v24, %v292_v28  ;;  %v582_v18 = vmul.f32 %v537_v16, %v310_v2  ;;  %v547_v31 = vpop.permute.xlu2 %546 }
  0xb8   :  { %v579_v53 = vmul.f32 %v522_v52, %v302_v29  ;;  %v678_v29 = vpop.permute.xlu1 %677 }
  0xb9   :  { %v590_v32 = vpack.c.bf16 %v575_v30, %v574_v25 }
  0xba   :  { %v592_v60 = vpack.c.bf16 %v579_v53, %v578_v56  ;;  %1013 = vmatmul.bf16.gmra.mxu3 %v1383_v27 }
  0xbb   :  { %838 = vmatmul.bf16.vlgmr.msrb.gmra.mxu2 %v590_v32  ;;  %v320_v32 = vpop.f32.mrf.mxu3 }
  0xbc   :  { %v552_v33 = vpop.permute.xlu0 %551 }
  0xbe   :  { %v295_v39 = vpop.f32.mrf.mxu0  ;;  %v312_v13 = vpop.f32.mrf.mxu2 }
  0xbf   :  { %v305_v40 = vpop.f32.mrf.mxu1  ;;  %v576_v43 = vmul.f32 %v507_v37, %v295_v39  ;;  %v583_v19 = vmul.f32 %v542_v17, %v312_v13 }
  0xc0   :  { %v580_v6 = vmul.f32 %v527_v4, %v305_v40 }
  0xc1   :  { %v594_v24 = vpack.c.bf16 %v583_v19, %v582_v18 }
  0xc2   :  { %421 = vmatmul.bf16.gmra.mxu1 %v200_v38 }
  0xc6   :  { %v297_v44 = vpop.f32.mrf.mxu0  ;;  %v315_v23 = vpop.f32.mrf.mxu2 }
  0xc7   :  { %v307_v45 = vpop.f32.mrf.mxu1  ;;  %v577_v46 = vmul.f32 %v512_v42, %v297_v44  ;;  %v584_v34 = vmul.f32 %v547_v31, %v315_v23  ;;  %v1384_v42 = vld [vmem:[%s1916_s0 + $0x38] sm:$0xff]  ;;  %v322_v44 = vpop.f32.mrf.mxu3 }
  0xc8   :  { %v581_v3 = vmul.f32 %v532_v1, %v307_v45 }
  0xc9   :  { %v591_v47 = vpack.c.bf16 %v577_v46, %v576_v43  ;;  %v688_v43 = vpop.permute.xlu2 %687 }
  0xca   :  { %v593_v9 = vpack.c.bf16 %v581_v3, %v580_v6  ;;  %1018 = vmatmul.bf16.gmra.mxu3 %v1384_v42 }
  0xcb   :  { %843 = vmatmul.bf16.gmra.mxu2 %v591_v47  ;;  %v557_v47 = vpop.permute.xlu0 %556 }
  0xcc   :  { %v586_v49 = vmul.f32 %v557_v47, %v320_v32 }
  0xce   :  { %v317_v30 = vpop.f32.mrf.mxu2 }
  0xcf   :  { %v387_v50 = vpop.f32.mrf.mxu1  ;;  %v585_v35 = vmul.f32 %v552_v33, %v317_v30  ;;  %v325_v54 = vpop.f32.mrf.mxu3 }
  0xd0   :  { %v710_v57 = vmul.f32 %v633_v36, %v387_v50 }
  0xd1   :  { %v595_v39 = vpack.c.bf16 %v585_v35, %v584_v34  ;;  %v693_v53 = vpop.permute.xlu2 %692 }
  0xd3   :  { %v698_v6 = vpop.permute.xlu0 %697 }
  0xd7   :  { %v389_v55 = vpop.f32.mrf.mxu1 }
  0xd8   :  { %v711_v58 = vmul.f32 %v638_v41, %v389_v55  ;;  %v683_v41 = vpop.permute.xlu1 %682 }
  0xda   :  { %v726_v59 = vpack.c.bf16 %v711_v58, %v710_v57  ;;  %v572_v58 = vpop.permute.xlu2 %571 }
  0xdb   :  { %848 = vmatmul.bf16.gmra.mxu2 %v592_v60 }
  0xdc   :  { %1096 = vmatmul.bf16.vlgmr.msrb.gmra.mxu0 %v726_v59  ;;  %v327_v59 = vpop.f32.mrf.mxu3 }
  0xdd   :  { %v589_v62 = vmul.f32 %v572_v58, %v327_v59 }
  0xdf   :  { %v392_v63 = vpop.f32.mrf.mxu1 }
  0xe0   :  { %v712_v7 = vmul.f32 %v643_v48, %v392_v63  ;;  %v562_v46 = vpop.permute.xlu1 %561 }
  0xe1   :  { %v587_v48 = vmul.f32 %v562_v46, %v322_v44 }
  0xe3   :  { %v596_v55 = vpack.c.bf16 %v587_v48, %v586_v49 }
  0xe7   :  { %v394_v5 = vpop.f32.mrf.mxu1 }
  0xe8   :  { %v713_v8 = vmul.f32 %v648_v51, %v394_v5  ;;  %v567_v60 = vpop.permute.xlu1 %566  ;;  %v984_v5 = vpop.f32.mrf.mxu3 }
  0xea   :  { %v727_v10 = vpack.c.bf16 %v713_v8, %v712_v7 }
  0xeb   :  { %853 = vmatmul.bf16.gmra.mxu2 %v593_v9 }
  0xec   :  { %1101 = vmatmul.bf16.gmra.mxu0 %v727_v10 }
  0xef   :  { %v397_v15 = vpop.f32.mrf.mxu1 }
  0xf0   :  { %v714_v21 = vmul.f32 %v653_v61, %v397_v15  ;;  %v588_v61 = vmul.f32 %v567_v60, %v325_v54  ;;  %v986_v13 = vpop.f32.mrf.mxu3  ;;  %v708_v15 = vpop.permute.xlu1 %707 }
  0xf2   :  { %v597_v2 = vpack.c.bf16 %v589_v62, %v588_v61 }
  0xf7   :  { %v399_v20 = vpop.f32.mrf.mxu1 }
  0xf8   :  { %v715_v22 = vmul.f32 %v658_v0, %v399_v20 }
  0xfa   :  { %v728_v25 = vpack.c.bf16 %v715_v22, %v714_v21  ;;  %v989_v21 = vpop.f32.mrf.mxu3 }
  0xfb   :  { %858 = vmatmul.bf16.gmra.mxu2 %v594_v24 }
  0xfc   :  { %1106 = vmatmul.bf16.gmra.mxu0 %v728_v25 }
  0xff   :  { %v402_v28 = vpop.f32.mrf.mxu1 }
 0x100   :  { %v716_v37 = vmul.f32 %v663_v11, %v402_v28 }
 0x102   :  { %v991_v23 = vpop.f32.mrf.mxu3 }
 0x107   :  { %v404_v36 = vpop.f32.mrf.mxu1 }
 0x108   :  { %v717_v38 = vmul.f32 %v668_v14, %v404_v36  ;;  %v703_v14 = vpop.permute.xlu0 %702 }
 0x10a   :  { %v729_v40 = vpack.c.bf16 %v717_v38, %v716_v37  ;;  %v994_v30 = vpop.f32.mrf.mxu3 }
 0x10b   :  { %863 = vmatmul.bf16.gmra.mxu2 %v595_v39 }
 0x10c   :  { %1111 = vmatmul.bf16.gmra.mxu0 %v729_v40 }
 0x10f   :  { %v407_v45 = vpop.f32.mrf.mxu1 }
 0x110   :  { %v718_v51 = vmul.f32 %v673_v26, %v407_v45  ;;  %v1892_v26 = vld [vmem:[%s1923_s7] ss:$0 sm:$0xff]  ;;  %s1556_s7 = smov [#allocation10]  }
 0x111   :  { %s1193_s28 = sshll.u32 %s1556_s7, 4  ;;  %s1194_s28 = int_to_ptr.vmem [resolvable:$true] %s1193_s28 }
 0x112   :  { %v996_v37 = vpop.f32.mrf.mxu3 }
 0x117   :  { %v409_v50 = vpop.f32.mrf.mxu1 }
 0x118   :  { %v719_v52 = vmul.f32 %v678_v29, %v409_v50 }
 0x11a   :  { %v730_v56 = vpack.c.bf16 %v719_v52, %v718_v51  ;;  %v999_v44 = vpop.f32.mrf.mxu3 }
 0x11b   :  { %868 = vmatmul.bf16.gmra.mxu2 %v596_v55 }
 0x11c   :  { %1116 = vmatmul.bf16.gmra.mxu0 %v730_v56 }
 0x11f   :  { %v412_v57 = vpop.f32.mrf.mxu1 }
 0x120   :  { %v720_v0 = vmul.f32 %v683_v41, %v412_v57 }
 0x122   :  { %v1001_v51 = vpop.f32.mrf.mxu3 }
 0x127   :  { %v414_v63 = vpop.f32.mrf.mxu1 }
 0x128   :  { %v721_v1 = vmul.f32 %v688_v43, %v414_v63 }
 0x12a   :  { %v731_v3 = vpack.c.bf16 %v721_v1, %v720_v0  ;;  %v1004_v58 = vpop.f32.mrf.mxu3 }
 0x12b   :  { %873 = vmatmul.bf16.gmra.mxu2 %v597_v2 }
 0x12c   :  { %1121 = vmatmul.bf16.gmra.mxu0 %v731_v3 }
 0x12f   :  { %v417_v4 = vpop.f32.mrf.mxu1 }
 0x130   :  { %v722_v8 = vmul.f32 %v693_v53, %v417_v4 }
 0x132   :  { %v1006_v1 = vpop.f32.mrf.mxu3 }
 0x137   :  { %v419_v7 = vpop.f32.mrf.mxu1 }
 0x138   :  { %v723_v9 = vmul.f32 %v698_v6, %v419_v7 }
 0x13a   :  { %v732_v10 = vpack.c.bf16 %v723_v9, %v722_v8  ;;  %v1009_v8 = vpop.f32.mrf.mxu3 }
 0x13c   :  { %1126 = vmatmul.bf16.gmra.mxu0 %v732_v10 }
 0x13e   :  { %v839_v12 = vpop.f32.mrf.mxu2 }
 0x13f   :  { %v422_v11 = vpop.f32.mrf.mxu1  ;;  %v985_v25 = vadd.f32 %v984_v5, %v839_v12 }
 0x140   :  { %v724_v18 = vmul.f32 %v703_v14, %v422_v11 }
 0x142   :  { %v1011_v14 = vpop.f32.mrf.mxu3 }
 0x146   :  { %v841_v17 = vpop.f32.mrf.mxu2 }
 0x147   :  { %v424_v16 = vpop.f32.mrf.mxu1  ;;  %v987_v32 = vadd.f32 %v986_v13, %v841_v17 }
 0x148   :  { %v725_v19 = vmul.f32 %v708_v15, %v424_v16 }
 0x14a   :  { %v733_v20 = vpack.c.bf16 %v725_v19, %v724_v18 }
 0x14c   :  { %1131 = vmatmul.bf16.gmra.mxu0 %v733_v20 }
 0x14e   :  { %v844_v22 = vpop.f32.mrf.mxu2 }
 0x14f   :  { %v990_v36 = vadd.f32 %v989_v21, %v844_v22  ;;  %v1014_v22 = vpop.f32.mrf.mxu3 }
 0x156   :  { %v846_v24 = vpop.f32.mrf.mxu2 }
 0x157   :  { %v992_v42 = vadd.f32 %v991_v23, %v846_v24 }
 0x159   :  { %v1097_v27 = vpop.f32.mrf.mxu0 }
 0x15a   :  { %v1137_v28 = vadd.f32 %v1097_v27, %v985_v25 }
 0x15c   :  { %v1157_v29 = vadd.f32 %v1892_v26, %v1137_v28 }
 0x15e   :  { %1173 = vst [vmem:[#allocation10] sm:$0xff] %v1157_v29  ;;  %v849_v31 = vpop.f32.mrf.mxu2 }
 0x15f   :  { %v995_v48 = vadd.f32 %v994_v30, %v849_v31  ;;  %v1016_v30 = vpop.f32.mrf.mxu3 }
 0x161   :  { %v1099_v33 = vpop.f32.mrf.mxu0 }
 0x162   :  { %v1138_v34 = vadd.f32 %v1099_v33, %v987_v32 }
 0x164   :  { %v1158_v35 = vadd.f32 %v1892_v26, %v1138_v34 }
 0x166   :  { %1174 = vst [vmem:[#allocation10 + $0x8] sm:$0xff] %v1158_v35  ;;  %v851_v38 = vpop.f32.mrf.mxu2 }
 0x167   :  { %v997_v54 = vadd.f32 %v996_v37, %v851_v38 }
 0x169   :  { %v1102_v39 = vpop.f32.mrf.mxu0 }
 0x16a   :  { %v1139_v40 = vadd.f32 %v1102_v39, %v990_v36  ;;  %v1019_v39 = vpop.f32.mrf.mxu3 }
 0x16c   :  { %v1159_v41 = vadd.f32 %v1892_v26, %v1139_v40 }
 0x16e   :  { %1175 = vst [vmem:[#allocation10 + $0x10] sm:$0xff] %v1159_v41  ;;  %v854_v46 = vpop.f32.mrf.mxu2 }
 0x16f   :  { %v1000_v60 = vadd.f32 %v999_v44, %v854_v46 }
 0x171   :  { %v1104_v43 = vpop.f32.mrf.mxu0 }
 0x172   :  { %v1140_v45 = vadd.f32 %v1104_v43, %v992_v42  ;;  %v1021_v46 = vpop.f32.mrf.mxu3 }
 0x174   :  { %v1160_v47 = vadd.f32 %v1892_v26, %v1140_v45 }
 0x176   :  { %1176 = vst [vmem:[#allocation10 + $0x18] sm:$0xff] %v1160_v47  ;;  %v856_v53 = vpop.f32.mrf.mxu2 }
 0x177   :  { %v1002_v0 = vadd.f32 %v1001_v51, %v856_v53 }
 0x179   :  { %v1107_v49 = vpop.f32.mrf.mxu0 }
 0x17a   :  { %v1141_v50 = vadd.f32 %v1107_v49, %v995_v48 }
 0x17c   :  { %v1161_v52 = vadd.f32 %v1892_v26, %v1141_v50 }
 0x17e   :  { %1177 = vst [vmem:[#allocation10 + $0x20] sm:$0xff] %v1161_v52  ;;  %v859_v59 = vpop.f32.mrf.mxu2 }
 0x17f   :  { %v1005_v6 = vadd.f32 %v1004_v58, %v859_v59 }
 0x181   :  { %v1109_v55 = vpop.f32.mrf.mxu0 }
 0x182   :  { %v1142_v56 = vadd.f32 %v1109_v55, %v997_v54 }
 0x184   :  { %v1162_v57 = vadd.f32 %v1892_v26, %v1142_v56 }
 0x186   :  { %1178 = vst [vmem:[#allocation10 + $0x28] sm:$0xff] %v1162_v57  ;;  %v861_v2 = vpop.f32.mrf.mxu2 }
 0x187   :  { %v1007_v12 = vadd.f32 %v1006_v1, %v861_v2 }
 0x189   :  { %v1112_v61 = vpop.f32.mrf.mxu0 }
 0x18a   :  { %v1143_v62 = vadd.f32 %v1112_v61, %v1000_v60 }
 0x18c   :  { %v1163_v63 = vadd.f32 %v1892_v26, %v1143_v62 }
 0x18e   :  { %1179 = vst [vmem:[#allocation10 + $0x30] sm:$0xff] %v1163_v63  ;;  %v864_v10 = vpop.f32.mrf.mxu2 }
 0x18f   :  { %v1010_v18 = vadd.f32 %v1009_v8, %v864_v10 }
 0x191   :  { %v1114_v3 = vpop.f32.mrf.mxu0 }
 0x192   :  { %v1144_v4 = vadd.f32 %v1114_v3, %v1002_v0 }
 0x194   :  { %v1164_v5 = vadd.f32 %v1892_v26, %v1144_v4 }
 0x196   :  { %1180 = vst [vmem:[#allocation10 + $0x38] sm:$0xff] %v1164_v5  ;;  %v866_v17 = vpop.f32.mrf.mxu2 }
 0x197   :  { %v1012_v24 = vadd.f32 %v1011_v14, %v866_v17 }
 0x199   :  { %v1117_v7 = vpop.f32.mrf.mxu0 }
 0x19a   :  { %v1145_v9 = vadd.f32 %v1117_v7, %v1005_v6 }
 0x19c   :  { %v1165_v11 = vadd.f32 %v1892_v26, %v1145_v9 }
 0x19e   :  { %1181 = vst [vmem:[#allocation10 + $0x40] sm:$0xff] %v1165_v11  ;;  %v869_v23 = vpop.f32.mrf.mxu2 }
 0x19f   :  { %v1015_v29 = vadd.f32 %v1014_v22, %v869_v23 }
 0x1a1   :  { %v1119_v13 = vpop.f32.mrf.mxu0 }
 0x1a2   :  { %v1146_v15 = vadd.f32 %v1119_v13, %v1007_v12 }
 0x1a4   :  { %v1166_v16 = vadd.f32 %v1892_v26, %v1146_v15 }
 0x1a6   :  { %1182 = vst [vmem:[#allocation10 + $0x48] sm:$0xff] %v1166_v16  ;;  %v871_v31 = vpop.f32.mrf.mxu2 }
 0x1a7   :  { %v1017_v35 = vadd.f32 %v1016_v30, %v871_v31 }
 0x1a9   :  { %v1122_v19 = vpop.f32.mrf.mxu0 }
 0x1aa   :  { %v1147_v20 = vadd.f32 %v1122_v19, %v1010_v18 }
 0x1ac   :  { %v1167_v21 = vadd.f32 %v1892_v26, %v1147_v20 }
 0x1ae   :  { %1183 = vst [vmem:[#allocation10 + $0x50] sm:$0xff] %v1167_v21  ;;  %v874_v38 = vpop.f32.mrf.mxu2 }
 0x1af   :  { %v1020_v41 = vadd.f32 %v1019_v39, %v874_v38 }
 0x1b1   :  { %v1124_v25 = vpop.f32.mrf.mxu0 }
 0x1b2   :  { %v1148_v27 = vadd.f32 %v1124_v25, %v1012_v24 }
 0x1b4   :  { %v1168_v28 = vadd.f32 %v1892_v26, %v1148_v27 }
 0x1b6   :  { %1184 = vst [vmem:[#allocation10 + $0x58] sm:$0xff] %v1168_v28  ;;  %v876_v45 = vpop.f32.mrf.mxu2 }
 0x1b7   :  { %v1022_v47 = vadd.f32 %v1021_v46, %v876_v45 }
 0x1b9   :  { %v1127_v32 = vpop.f32.mrf.mxu0 }
 0x1ba   :  { %v1149_v33 = vadd.f32 %v1127_v32, %v1015_v29 }
 0x1bc   :  { %v1169_v34 = vadd.f32 %v1892_v26, %v1149_v33 }
 0x1be   :  { %1185 = vst [vmem:[#allocation10 + $0x60] sm:$0xff] %v1169_v34 }
 0x1c1   :  { %v1129_v36 = vpop.f32.mrf.mxu0 }
 0x1c2   :  { %v1150_v37 = vadd.f32 %v1129_v36, %v1017_v35 }
 0x1c4   :  { %v1170_v40 = vadd.f32 %v1892_v26, %v1150_v37 }
 0x1c6   :  { %1186 = vst [vmem:[#allocation10 + $0x68] sm:$0xff] %v1170_v40 }
 0x1c9   :  { %v1132_v42 = vpop.f32.mrf.mxu0 }
 0x1ca   :  { %v1151_v43 = vadd.f32 %v1132_v42, %v1020_v41 }
 0x1cc   :  { %v1171_v44 = vadd.f32 %v1892_v26, %v1151_v43 }
 0x1ce   :  { %1187 = vst [vmem:[#allocation10 + $0x70] sm:$0xff] %v1171_v44 }
 0x1d1   :  { %v1134_v48 = vpop.f32.mrf.mxu0 }
 0x1d2   :  { %v1152_v49 = vadd.f32 %v1134_v48, %v1022_v47 }
 0x1d4   :  { %v1172_v50 = vadd.f32 %v1892_v26, %v1152_v49 }
 0x1d6   :  { %1188 = vst [vmem:[#allocation10 + $0x78] sm:$0xff] %v1172_v50 }
 0x1d7   :  { %1201 = dma.vmem_to_hbm [thread:$0]  %s1194_s28, 2048, %s1196_s9, [#allocation6], %s1549_s13, %s1549_s13, %s1550_s14  }
 0x1d8   :  { %1546 = dma.done.wait [#allocation6], 2048  }
 0x1d9   :  { %1547 = vsyncadd [#allocation6], 4294965248 }
 0x1da   :  { %1206 = vsyncpa [#allocation5], 1 }
 0x1db   :  { %1207 = vsyncpa [#allocation8], 1 }
 0x1dc   :  { %1208 = vsyncpa [#allocation6], 1 }

</bundles_post_ra>
